<compile_context>
chip_gen: v7x
topology: tpu7x:2x2x1
jax: 0.10.0
libtpu: 0.0.40
codegen_flags: <defaults>
</compile_context>

<pallas_src>
import math

import jax
import jax.numpy as jnp
import numpy as np
from jax import lax
from jax.experimental import pallas as pl
from jax.experimental.pallas import tpu as pltpu

# ---- config (small, consistent with the module) -----------------------------
D_MODEL = 32
N_HEADS = 4
D_HEAD = D_MODEL // N_HEADS
EXPANSION = 4
D_HIDDEN = D_MODEL * EXPANSION
LN_EPS = 1e-5
NEG_INF = -1e30

# Row indices inside the packed (8, 128) small-parameter slab.
_ROW_ATTN_G, _ROW_ATTN_B, _ROW_BQKV, _ROW_BO = 0, 1, 2, 3
_ROW_FFN_G, _ROW_FFN_B, _ROW_B1, _ROW_B2 = 4, 5, 6, 7


# ---- in-kernel helpers -------------------------------------------------------
def _layernorm(x, gamma, beta, eps):
    mean = jnp.mean(x, axis=-1, keepdims=True)
    var = jnp.mean(jnp.square(x - mean), axis=-1, keepdims=True)
    return (x - mean) * lax.rsqrt(var + eps) * gamma + beta


def _gelu_exact(x):
    # F.gelu default is the exact (erf) form.
    return 0.5 * x * (1.0 + lax.erf(x / math.sqrt(2.0)))


# ---- fused kernel: pre-LN ALiBi MHA + residual, pre-LN FFN + residual --------
def fused_layer_kernel(x_ref, consts_ref, wqkv_ref, wo_ref, w1_ref, w2_ref,
                       o_ref):
    B, S, D = x_ref.shape
    BH = B * N_HEADS

    x = x_ref[...]                                   # (B, S, D)
    c = consts_ref[...]                              # (8, 128) packed slab

    attn_g = c[_ROW_ATTN_G:_ROW_ATTN_G + 1, :D_MODEL]        # (1, D)
    attn_b = c[_ROW_ATTN_B:_ROW_ATTN_B + 1, :D_MODEL]
    bqkv   = c[_ROW_BQKV:_ROW_BQKV + 1, :3 * D_MODEL]        # (1, 3D)
    bo     = c[_ROW_BO:_ROW_BO + 1, :D_MODEL]
    ffn_g  = c[_ROW_FFN_G:_ROW_FFN_G + 1, :D_MODEL]
    ffn_b  = c[_ROW_FFN_B:_ROW_FFN_B + 1, :D_MODEL]
    b1     = c[_ROW_B1:_ROW_B1 + 1, :D_HIDDEN]               # (1, Dh)
    b2     = c[_ROW_B2:_ROW_B2 + 1, :D_MODEL]

    # ----------------- attention branch (pre-LN) -----------------
    h = _layernorm(x, attn_g, attn_b, LN_EPS)                # (B, S, D)

    # One fused (B*S, D) x (D, 3D) MXU matmul for Q, K, V.
    qkv = jnp.dot(h.reshape(B * S, D), wqkv_ref[...],
                  preferred_element_type=jnp.float32) + bqkv  # (B*S, 3D)
    qkv = qkv.reshape(B, S, 3 * D_MODEL)

    # Batch-and-head batched (B*H, S, dh) tensors; static lane slices from the
    # fused QKV output stacked along cheap leading axes.
    def split_heads(off):
        return jnp.stack(
            [qkv[:, :, off + i * D_HEAD: off + (i + 1) * D_HEAD]
             for i in range(N_HEADS)], axis=1).reshape(BH, S, D_HEAD)

    qh = split_heads(0)
    kh = split_heads(D_MODEL)
    vh = split_heads(2 * D_MODEL)

    # Scores for all (batch, head) pairs at once (single-batch-dim einsum).
    s = jnp.einsum("nqd,nkd->nqk", qh, kh,
                   preferred_element_type=jnp.float32)        # (B*H, S, S)
    s = s * (1.0 / math.sqrt(D_HEAD))

    # ALiBi + causal bias: built once at (S,S); per-head scalar slopes are
    # baked Python constants (no slope input, no (H,S,S) iota/compare work).
    q_idx = lax.broadcasted_iota(jnp.int32, (S, S), 0)
    k_idx = lax.broadcasted_iota(jnp.int32, (S, S), 1)
    rel = (k_idx - q_idx).astype(jnp.float32)                 # j - i
    causal = k_idx <= q_idx                                   # (S, S)
    start = 2.0 ** (-8.0 / N_HEADS)
    alibi = jnp.stack([(start ** (hh + 1)) * rel
                       for hh in range(N_HEADS)], axis=0)     # (H, S, S)
    alibi = jnp.concatenate([alibi] * B, axis=0)              # (B*H, S, S)
    s = jnp.where(causal[None], s + alibi, NEG_INF)

    # Softmax; approx reciprocal (EUP) + one Newton step -> ~f32 accuracy.
    m = jnp.max(s, axis=-1, keepdims=True)
    e = jnp.exp(s - m)
    denom = jnp.sum(e, axis=-1, keepdims=True)
    r = pl.reciprocal(denom, approx=True)
    r = r * (2.0 - denom * r)
    p = e * r

    ctx = jnp.einsum("nqk,nkd->nqd", p, vh,
                     preferred_element_type=jnp.float32)      # (B*H, S, dh)

    # Reassemble heads into a single (B*S, D) tile with one lane concat and do
    # ONE output-projection matmul.
    ctx = ctx.reshape(B, N_HEADS, S, D_HEAD)
    ctx = jnp.concatenate([ctx[:, hh] for hh in range(N_HEADS)], axis=-1)
    attn = jnp.dot(ctx.reshape(B * S, D), wo_ref[...],
                   preferred_element_type=jnp.float32) + bo   # (B*S, D)

    x = x + attn.reshape(B, S, D)            # residual 1 (dropout = identity)

    # ----------------- feed-forward branch (pre-LN) -----------------
    h2 = _layernorm(x, ffn_g, ffn_b, LN_EPS)
    a = jnp.dot(h2.reshape(B * S, D), w1_ref[...],
                preferred_element_type=jnp.float32) + b1      # (B*S, Dh)
    a = _gelu_exact(a)
    y = jnp.dot(a, w2_ref[...],
                preferred_element_type=jnp.float32) + b2      # (B*S, D)

    o_ref[...] = x + y.reshape(B, S, D)      # residual 2 (dropout = identity)


# ---- wrapper -----------------------------------------------------------------
def alibi_transformer_layer(x, p):
    B, S, D = x.shape
    assert D == D_MODEL

    # Pack the 8 tiny parameter vectors into one (8, 128) f32 slab (one vreg),
    # each row zero-padded along lanes; sliced with static offsets in-kernel.
    def row(v):
        v = jnp.asarray(v, jnp.float32).reshape(-1)
        return jnp.pad(v, (0, 128 - v.shape[0]))

    consts = jnp.stack([row(p["attn_gamma"]), row(p["attn_beta"]),
                        row(p["bqkv"]), row(p["bo"]),
                        row(p["ffn_gamma"]), row(p["ffn_beta"]),
                        row(p["b1"]), row(p["b2"])], axis=0)   # (8, 128)

    def full(a):
        return pl.BlockSpec(a.shape, lambda i, _n=a.ndim: (0,) * _n)

    cp = pltpu.CompilerParams(
        # Single grid step: the kernel is overhead-bound at these shapes.
        dimension_semantics=("arbitrary",),
        # All inputs + activations are well under 1 MiB even double-buffered;
        # this limit leaves ample headroom on 64 MiB-VMEM v7x parts.
        vmem_limit_bytes=16 * 1024 * 1024,
    )

    return pl.pallas_call(
        fused_layer_kernel,
        out_shape=jax.ShapeDtypeStruct((B, S, D), jnp.float32),
        grid=(1,),
        in_specs=[full(x), full(consts), full(p["wqkv"]), full(p["wo"]),
                  full(p["w1"]), full(p["w2"])],
        out_specs=full(x),
        compiler_params=cp,
    )(x, consts, p["wqkv"], p["wo"], p["w1"], p["w2"])


# ---- pure-JAX reference for verification --------------------------------------
def make_alibi_bias(n_heads, seq_len):
    start = 2.0 ** (-8.0 / n_heads)
    slopes = jnp.array([start ** (i + 1) for i in range(n_heads)], jnp.float32)
    pos = jnp.arange(seq_len)
    rel = (pos[None, :] - pos[:, None]).astype(jnp.float32)          # j - i
    bias = slopes[:, None, None] * rel[None, :, :]
    causal = (pos[None, :] <= pos[:, None])
    return jnp.where(causal[None, :, :], bias, jnp.float32(NEG_INF))  # (H, S, S)


def reference(x, p, alibi_bias):
    def ln(t, g, b):
        m = t.mean(-1, keepdims=True)
        v = ((t - m) ** 2).mean(-1, keepdims=True)
        return (t - m) / jnp.sqrt(v + LN_EPS) * g[0] + b[0]

    B, S, D = x.shape
    h = ln(x, p["attn_gamma"], p["attn_beta"])
    qkv = h @ p["wqkv"] + p["bqkv"][0]
    q, k, v = jnp.split(qkv, 3, axis=-1)
    q = q.reshape(B, S, N_HEADS, D_HEAD).transpose(0, 2, 1, 3)
    k = k.reshape(B, S, N_HEADS, D_HEAD).transpose(0, 2, 1, 3)
    v = v.reshape(B, S, N_HEADS, D_HEAD).transpose(0, 2, 1, 3)
    s = jnp.einsum("bhqd,bhkd->bhqk", q, k) / math.sqrt(D_HEAD) + alibi_bias[None]
    pmat = jax.nn.softmax(s, axis=-1)
    ctx = jnp.einsum("bhqk,bhkd->bhqd", pmat, v).transpose(0, 2, 1, 3).reshape(B, S, D)
    x = x + ctx @ p["wo"] + p["bo"][0]

    h = ln(x, p["ffn_gamma"], p["ffn_beta"])
    a = h @ p["w1"] + p["b1"][0]
    a = 0.5 * a * (1.0 + lax.erf(a / math.sqrt(2.0)))
    return x + a @ p["w2"] + p["b2"][0]


# ---- main ---------------------------------------------------------------------
if __name__ == "__main__":
    B, S = 2, 8
    key = jax.random.PRNGKey(0)
    ks = jax.random.split(key, 8)

    def init(k, shape, scale=0.05):
        return (jax.random.normal(k, shape, jnp.float32) * scale).astype(jnp.float32)

    params = {
        "attn_gamma": jnp.ones((1, D_MODEL), jnp.float32),
        "attn_beta": jnp.zeros((1, D_MODEL), jnp.float32),
        "wqkv": init(ks[0], (D_MODEL, 3 * D_MODEL)),
        "bqkv": init(ks[1], (1, 3 * D_MODEL)),
        "wo": init(ks[2], (D_MODEL, D_MODEL)),
        "bo": init(ks[3], (1, D_MODEL)),
        "ffn_gamma": jnp.ones((1, D_MODEL), jnp.float32),
        "ffn_beta": jnp.zeros((1, D_MODEL), jnp.float32),
        "w1": init(ks[4], (D_MODEL, D_HIDDEN)),
        "b1": init(ks[5], (1, D_HIDDEN)),
        "w2": init(ks[6], (D_HIDDEN, D_MODEL)),
        "b2": init(ks[7], (1, D_MODEL)),
    }

    x = jax.random.normal(jax.random.PRNGKey(42), (B, S, D_MODEL), jnp.float32)

    out = jax.block_until_ready(alibi_transformer_layer(x, params))
    ref = jax.block_until_ready(reference(x, params, make_alibi_bias(N_HEADS, S)))
    np.testing.assert_allclose(np.asarray(out), np.asarray(ref), rtol=1e-4, atol=1e-4)
    print("KERNEL_OK")
</pallas_src>

<mosaic_0001>
module attributes {stable_mosaic.version = 11 : i64} {
  func.func @fused_layer_kernel(%arg0: i32, %arg1: memref<2x8x32xf32, #tpu.memory_space<vmem>>, %arg2: memref<8x128xf32, #tpu.memory_space<vmem>>, %arg3: memref<32x96xf32, #tpu.memory_space<vmem>>, %arg4: memref<32x32xf32, #tpu.memory_space<vmem>>, %arg5: memref<32x128xf32, #tpu.memory_space<vmem>>, %arg6: memref<128x32xf32, #tpu.memory_space<vmem>>, %arg7: memref<2x8x32xf32, #tpu.memory_space<vmem>>) attributes {dimension_semantics = [#tpu.dimension_semantics<arbitrary>], iteration_bounds = array<i64: 1>, scalar_prefetch = 0 : i64, scratch_operands = 0 : i64, tpu.core_type = #tpu.core_type<tc>, window_params = [{pipeline_mode = #tpu.pipeline_mode<synchronous>, transform_indices = @transform_0, window_bounds = array<i64: 2, 8, 32>}, {pipeline_mode = #tpu.pipeline_mode<synchronous>, transform_indices = @transform_1, window_bounds = array<i64: 8, 128>}, {pipeline_mode = #tpu.pipeline_mode<synchronous>, transform_indices = @transform_2, window_bounds = array<i64: 32, 96>}, {pipeline_mode = #tpu.pipeline_mode<synchronous>, transform_indices = @transform_3, window_bounds = array<i64: 32, 32>}, {pipeline_mode = #tpu.pipeline_mode<synchronous>, transform_indices = @transform_4, window_bounds = array<i64: 32, 128>}, {pipeline_mode = #tpu.pipeline_mode<synchronous>, transform_indices = @transform_5, window_bounds = array<i64: 128, 32>}, {pipeline_mode = #tpu.pipeline_mode<synchronous>, transform_indices = @transform_6, window_bounds = array<i64: 2, 8, 32>}]} {
    %c0 = arith.constant 0 : index
    %c0_0 = arith.constant 0 : index
    %c0_1 = arith.constant 0 : index
    %0 = vector.load %arg1[%c0, %c0_0, %c0_1] : memref<2x8x32xf32, #tpu.memory_space<vmem>>, vector<2x8x32xf32>
    %c0_2 = arith.constant 0 : index
    %c0_3 = arith.constant 0 : index
    %1 = vector.load %arg2[%c0_2, %c0_3] : memref<8x128xf32, #tpu.memory_space<vmem>>, vector<8x128xf32>
    %2 = vector.extract_strided_slice %1 {offsets = [0, 0], sizes = [1, 32], strides = [1, 1]} : vector<8x128xf32> to vector<1x32xf32>
    %3 = vector.extract_strided_slice %1 {offsets = [1, 0], sizes = [1, 32], strides = [1, 1]} : vector<8x128xf32> to vector<1x32xf32>
    %4 = vector.extract_strided_slice %1 {offsets = [2, 0], sizes = [1, 96], strides = [1, 1]} : vector<8x128xf32> to vector<1x96xf32>
    %5 = vector.extract_strided_slice %1 {offsets = [3, 0], sizes = [1, 32], strides = [1, 1]} : vector<8x128xf32> to vector<1x32xf32>
    %6 = vector.extract_strided_slice %1 {offsets = [4, 0], sizes = [1, 32], strides = [1, 1]} : vector<8x128xf32> to vector<1x32xf32>
    %7 = vector.extract_strided_slice %1 {offsets = [5, 0], sizes = [1, 32], strides = [1, 1]} : vector<8x128xf32> to vector<1x32xf32>
    %8 = vector.extract_strided_slice %1 {offsets = [6, 0], sizes = [1, 128], strides = [1, 1]} : vector<8x128xf32> to vector<1x128xf32>
    %9 = vector.extract_strided_slice %1 {offsets = [7, 0], sizes = [1, 32], strides = [1, 1]} : vector<8x128xf32> to vector<1x32xf32>
    %cst = arith.constant dense<0.000000e+00> : vector<2x8xf32>
    %10 = vector.multi_reduction <add>, %0, %cst [2] : vector<2x8x32xf32> to vector<2x8xf32>
    %11 = vector.shape_cast %10 : vector<2x8xf32> to vector<2x8x1xf32>
    %cst_4 = arith.constant 3.200000e+01 : f32
    %12 = vector.broadcast %cst_4 : f32 to vector<2x8x1xf32>
    %13 = arith.divf %11, %12 : vector<2x8x1xf32>
    %14 = vector.broadcast %13 : vector<2x8x1xf32> to vector<2x8x32xf32>
    %15 = arith.subf %0, %14 : vector<2x8x32xf32>
    %16 = arith.mulf %15, %15 : vector<2x8x32xf32>
    %cst_5 = arith.constant dense<0.000000e+00> : vector<2x8xf32>
    %17 = vector.multi_reduction <add>, %16, %cst_5 [2] : vector<2x8x32xf32> to vector<2x8xf32>
    %18 = vector.shape_cast %17 : vector<2x8xf32> to vector<2x8x1xf32>
    %cst_6 = arith.constant 3.200000e+01 : f32
    %19 = vector.broadcast %cst_6 : f32 to vector<2x8x1xf32>
    %20 = arith.divf %18, %19 : vector<2x8x1xf32>
    %21 = vector.broadcast %13 : vector<2x8x1xf32> to vector<2x8x32xf32>
    %22 = arith.subf %0, %21 : vector<2x8x32xf32>
    %cst_7 = arith.constant 9.99999974E-6 : f32
    %23 = vector.broadcast %cst_7 : f32 to vector<2x8x1xf32>
    %24 = arith.addf %20, %23 : vector<2x8x1xf32>
    %25 = math.rsqrt %24 : vector<2x8x1xf32>
    %26 = vector.broadcast %25 : vector<2x8x1xf32> to vector<2x8x32xf32>
    %27 = arith.mulf %22, %26 : vector<2x8x32xf32>
    %28 = vector.shape_cast %2 : vector<1x32xf32> to vector<1x1x32xf32>
    %29 = vector.broadcast %28 : vector<1x1x32xf32> to vector<2x8x32xf32>
    %30 = arith.mulf %27, %29 : vector<2x8x32xf32>
    %31 = vector.shape_cast %3 : vector<1x32xf32> to vector<1x1x32xf32>
    %32 = vector.broadcast %31 : vector<1x1x32xf32> to vector<2x8x32xf32>
    %33 = arith.addf %30, %32 : vector<2x8x32xf32>
    %34 = vector.shape_cast %33 : vector<2x8x32xf32> to vector<16x32xf32>
    %c0_8 = arith.constant 0 : index
    %c0_9 = arith.constant 0 : index
    %35 = vector.load %arg3[%c0_8, %c0_9] : memref<32x96xf32, #tpu.memory_space<vmem>>, vector<32x96xf32>
    %cst_10 = arith.constant dense<0.000000e+00> : vector<16x96xf32>
    %36 = tpu.matmul %34, %35, %cst_10 {dimension_numbers = #tpu.dot_dimension_numbers<[1], [0], [0], [1], [0, 0, 1, 1], [], []>} : vector<16x32xf32>, vector<32x96xf32>, vector<16x96xf32> -> vector<16x96xf32>
    %37 = vector.broadcast %4 : vector<1x96xf32> to vector<16x96xf32>
    %38 = arith.addf %36, %37 : vector<16x96xf32>
    %39 = vector.shape_cast %38 : vector<16x96xf32> to vector<2x8x96xf32>
    %40 = vector.extract_strided_slice %39 {offsets = [0, 0, 0], sizes = [2, 8, 8], strides = [1, 1, 1]} : vector<2x8x96xf32> to vector<2x8x8xf32>
    %41 = vector.extract_strided_slice %39 {offsets = [0, 0, 8], sizes = [2, 8, 8], strides = [1, 1, 1]} : vector<2x8x96xf32> to vector<2x8x8xf32>
    %42 = vector.extract_strided_slice %39 {offsets = [0, 0, 16], sizes = [2, 8, 8], strides = [1, 1, 1]} : vector<2x8x96xf32> to vector<2x8x8xf32>
    %43 = vector.extract_strided_slice %39 {offsets = [0, 0, 24], sizes = [2, 8, 8], strides = [1, 1, 1]} : vector<2x8x96xf32> to vector<2x8x8xf32>
    %44 = vector.shape_cast %40 : vector<2x8x8xf32> to vector<2x1x8x8xf32>
    %45 = vector.shape_cast %41 : vector<2x8x8xf32> to vector<2x1x8x8xf32>
    %46 = vector.shape_cast %42 : vector<2x8x8xf32> to vector<2x1x8x8xf32>
    %47 = vector.shape_cast %43 : vector<2x8x8xf32> to vector<2x1x8x8xf32>
    %48 = tpu.concatenate %44, %45, %46, %47 in 1 : vector<2x1x8x8xf32>, vector<2x1x8x8xf32>, vector<2x1x8x8xf32>, vector<2x1x8x8xf32> -> vector<2x4x8x8xf32>
    %49 = vector.shape_cast %48 : vector<2x4x8x8xf32> to vector<8x8x8xf32>
    %50 = vector.extract_strided_slice %39 {offsets = [0, 0, 32], sizes = [2, 8, 8], strides = [1, 1, 1]} : vector<2x8x96xf32> to vector<2x8x8xf32>
    %51 = vector.extract_strided_slice %39 {offsets = [0, 0, 40], sizes = [2, 8, 8], strides = [1, 1, 1]} : vector<2x8x96xf32> to vector<2x8x8xf32>
    %52 = vector.extract_strided_slice %39 {offsets = [0, 0, 48], sizes = [2, 8, 8], strides = [1, 1, 1]} : vector<2x8x96xf32> to vector<2x8x8xf32>
    %53 = vector.extract_strided_slice %39 {offsets = [0, 0, 56], sizes = [2, 8, 8], strides = [1, 1, 1]} : vector<2x8x96xf32> to vector<2x8x8xf32>
    %54 = vector.shape_cast %50 : vector<2x8x8xf32> to vector<2x1x8x8xf32>
    %55 = vector.shape_cast %51 : vector<2x8x8xf32> to vector<2x1x8x8xf32>
    %56 = vector.shape_cast %52 : vector<2x8x8xf32> to vector<2x1x8x8xf32>
    %57 = vector.shape_cast %53 : vector<2x8x8xf32> to vector<2x1x8x8xf32>
    %58 = tpu.concatenate %54, %55, %56, %57 in 1 : vector<2x1x8x8xf32>, vector<2x1x8x8xf32>, vector<2x1x8x8xf32>, vector<2x1x8x8xf32> -> vector<2x4x8x8xf32>
    %59 = vector.shape_cast %58 : vector<2x4x8x8xf32> to vector<8x8x8xf32>
    %60 = vector.extract_strided_slice %39 {offsets = [0, 0, 64], sizes = [2, 8, 8], strides = [1, 1, 1]} : vector<2x8x96xf32> to vector<2x8x8xf32>
    %61 = vector.extract_strided_slice %39 {offsets = [0, 0, 72], sizes = [2, 8, 8], strides = [1, 1, 1]} : vector<2x8x96xf32> to vector<2x8x8xf32>
    %62 = vector.extract_strided_slice %39 {offsets = [0, 0, 80], sizes = [2, 8, 8], strides = [1, 1, 1]} : vector<2x8x96xf32> to vector<2x8x8xf32>
    %63 = vector.extract_strided_slice %39 {offsets = [0, 0, 88], sizes = [2, 8, 8], strides = [1, 1, 1]} : vector<2x8x96xf32> to vector<2x8x8xf32>
    %64 = vector.shape_cast %60 : vector<2x8x8xf32> to vector<2x1x8x8xf32>
    %65 = vector.shape_cast %61 : vector<2x8x8xf32> to vector<2x1x8x8xf32>
    %66 = vector.shape_cast %62 : vector<2x8x8xf32> to vector<2x1x8x8xf32>
    %67 = vector.shape_cast %63 : vector<2x8x8xf32> to vector<2x1x8x8xf32>
    %68 = tpu.concatenate %64, %65, %66, %67 in 1 : vector<2x1x8x8xf32>, vector<2x1x8x8xf32>, vector<2x1x8x8xf32>, vector<2x1x8x8xf32> -> vector<2x4x8x8xf32>
    %69 = vector.shape_cast %68 : vector<2x4x8x8xf32> to vector<8x8x8xf32>
    "tpu.trace_start"() <{level = 10 : i32, message = "nqd,nkd->nqk"}> : () -> ()
    %cst_11 = arith.constant dense<0.000000e+00> : vector<8x8x8xf32>
    %70 = tpu.matmul %49, %59, %cst_11 {dimension_numbers = #tpu.dot_dimension_numbers<[2], [2], [1], [1], [0, 0, 0, 1, 1, 1], [0], [0]>} : vector<8x8x8xf32>, vector<8x8x8xf32>, vector<8x8x8xf32> -> vector<8x8x8xf32>
    "tpu.trace_stop"() : () -> ()
    %cst_12 = arith.constant 0.353553385 : f32
    %71 = vector.broadcast %cst_12 : f32 to vector<8x8x8xf32>
    %72 = arith.mulf %70, %71 : vector<8x8x8xf32>
    %73 = tpu.iota {dimensions = array<i32: 0>} : vector<8x8xi32>
    %74 = tpu.iota {dimensions = array<i32: 1>} : vector<8x8xi32>
    %75 = arith.subi %74, %73 : vector<8x8xi32>
    %76 = arith.sitofp %75 : vector<8x8xi32> to vector<8x8xf32>
    %77 = arith.cmpi sle, %74, %73 : vector<8x8xi32>
    %cst_13 = arith.constant 2.500000e-01 : f32
    %78 = vector.broadcast %cst_13 : f32 to vector<8x8xf32>
    %79 = arith.mulf %78, %76 : vector<8x8xf32>
    %cst_14 = arith.constant 6.250000e-02 : f32
    %80 = vector.broadcast %cst_14 : f32 to vector<8x8xf32>
    %81 = arith.mulf %80, %76 : vector<8x8xf32>
    %cst_15 = arith.constant 1.562500e-02 : f32
    %82 = vector.broadcast %cst_15 : f32 to vector<8x8xf32>
    %83 = arith.mulf %82, %76 : vector<8x8xf32>
    %cst_16 = arith.constant 3.906250e-03 : f32
    %84 = vector.broadcast %cst_16 : f32 to vector<8x8xf32>
    %85 = arith.mulf %84, %76 : vector<8x8xf32>
    %86 = vector.shape_cast %79 : vector<8x8xf32> to vector<1x8x8xf32>
    %87 = vector.shape_cast %81 : vector<8x8xf32> to vector<1x8x8xf32>
    %88 = vector.shape_cast %83 : vector<8x8xf32> to vector<1x8x8xf32>
    %89 = vector.shape_cast %85 : vector<8x8xf32> to vector<1x8x8xf32>
    %90 = tpu.concatenate %86, %87, %88, %89 in 0 : vector<1x8x8xf32>, vector<1x8x8xf32>, vector<1x8x8xf32>, vector<1x8x8xf32> -> vector<4x8x8xf32>
    %91 = tpu.concatenate %90, %90 in 0 : vector<4x8x8xf32>, vector<4x8x8xf32> -> vector<8x8x8xf32>
    %92 = vector.shape_cast %77 : vector<8x8xi1> to vector<1x8x8xi1>
    %93 = arith.addf %72, %91 : vector<8x8x8xf32>
    %cst_17 = arith.constant -1.000000e+30 : f32
    %94 = vector.shape_cast %92 : vector<1x8x8xi1> to vector<1x8x8xi1>
    %95 = vector.broadcast %94 : vector<1x8x8xi1> to vector<8x8x8xi1>
    %96 = vector.broadcast %cst_17 : f32 to vector<8x8x8xf32>
    %97 = arith.select %95, %93, %96 : vector<8x8x8xi1>, vector<8x8x8xf32>
    %cst_18 = arith.constant dense<0xFF800000> : vector<8x8xf32>
    %98 = vector.multi_reduction <maximumf>, %97, %cst_18 [2] : vector<8x8x8xf32> to vector<8x8xf32>
    %99 = vector.shape_cast %98 : vector<8x8xf32> to vector<8x8x1xf32>
    %100 = vector.broadcast %99 : vector<8x8x1xf32> to vector<8x8x8xf32>
    %101 = arith.subf %97, %100 : vector<8x8x8xf32>
    %102 = math.exp %101 : vector<8x8x8xf32>
    %cst_19 = arith.constant dense<0.000000e+00> : vector<8x8xf32>
    %103 = vector.multi_reduction <add>, %102, %cst_19 [2] : vector<8x8x8xf32> to vector<8x8xf32>
    %104 = vector.shape_cast %103 : vector<8x8xf32> to vector<8x8x1xf32>
    %105 = tpu.reciprocal %104 {approx = true} : vector<8x8x1xf32> -> vector<8x8x1xf32>
    %106 = arith.mulf %104, %105 : vector<8x8x1xf32>
    %cst_20 = arith.constant 2.000000e+00 : f32
    %107 = vector.broadcast %cst_20 : f32 to vector<8x8x1xf32>
    %108 = arith.subf %107, %106 : vector<8x8x1xf32>
    %109 = arith.mulf %105, %108 : vector<8x8x1xf32>
    %110 = vector.broadcast %109 : vector<8x8x1xf32> to vector<8x8x8xf32>
    %111 = arith.mulf %102, %110 : vector<8x8x8xf32>
    "tpu.trace_start"() <{level = 10 : i32, message = "nqk,nkd->nqd"}> : () -> ()
    %cst_21 = arith.constant dense<0.000000e+00> : vector<8x8x8xf32>
    %112 = tpu.matmul %111, %69, %cst_21 {dimension_numbers = #tpu.dot_dimension_numbers<[2], [1], [1], [2], [0, 0, 0, 1, 1, 2], [0], [0]>} : vector<8x8x8xf32>, vector<8x8x8xf32>, vector<8x8x8xf32> -> vector<8x8x8xf32>
    "tpu.trace_stop"() : () -> ()
    %113 = vector.shape_cast %112 : vector<8x8x8xf32> to vector<2x4x8x8xf32>
    %114 = vector.extract_strided_slice %113 {offsets = [0, 0, 0, 0], sizes = [2, 1, 8, 8], strides = [1, 1, 1, 1]} : vector<2x4x8x8xf32> to vector<2x1x8x8xf32>
    %115 = vector.shape_cast %114 : vector<2x1x8x8xf32> to vector<2x8x8xf32>
    %116 = vector.extract_strided_slice %113 {offsets = [0, 1, 0, 0], sizes = [2, 1, 8, 8], strides = [1, 1, 1, 1]} : vector<2x4x8x8xf32> to vector<2x1x8x8xf32>
    %117 = vector.shape_cast %116 : vector<2x1x8x8xf32> to vector<2x8x8xf32>
    %118 = vector.extract_strided_slice %113 {offsets = [0, 2, 0, 0], sizes = [2, 1, 8, 8], strides = [1, 1, 1, 1]} : vector<2x4x8x8xf32> to vector<2x1x8x8xf32>
    %119 = vector.shape_cast %118 : vector<2x1x8x8xf32> to vector<2x8x8xf32>
    %120 = vector.extract_strided_slice %113 {offsets = [0, 3, 0, 0], sizes = [2, 1, 8, 8], strides = [1, 1, 1, 1]} : vector<2x4x8x8xf32> to vector<2x1x8x8xf32>
    %121 = vector.shape_cast %120 : vector<2x1x8x8xf32> to vector<2x8x8xf32>
    %122 = tpu.concatenate %115, %117, %119, %121 in 2 : vector<2x8x8xf32>, vector<2x8x8xf32>, vector<2x8x8xf32>, vector<2x8x8xf32> -> vector<2x8x32xf32>
    %123 = vector.shape_cast %122 : vector<2x8x32xf32> to vector<16x32xf32>
    %c0_22 = arith.constant 0 : index
    %c0_23 = arith.constant 0 : index
    %124 = vector.load %arg4[%c0_22, %c0_23] : memref<32x32xf32, #tpu.memory_space<vmem>>, vector<32x32xf32>
    %cst_24 = arith.constant dense<0.000000e+00> : vector<16x32xf32>
    %125 = tpu.matmul %123, %124, %cst_24 {dimension_numbers = #tpu.dot_dimension_numbers<[1], [0], [0], [1], [0, 0, 1, 1], [], []>} : vector<16x32xf32>, vector<32x32xf32>, vector<16x32xf32> -> vector<16x32xf32>
    %126 = vector.broadcast %5 : vector<1x32xf32> to vector<16x32xf32>
    %127 = arith.addf %125, %126 : vector<16x32xf32>
    %128 = vector.shape_cast %127 : vector<16x32xf32> to vector<2x8x32xf32>
    %129 = arith.addf %0, %128 : vector<2x8x32xf32>
    %cst_25 = arith.constant dense<0.000000e+00> : vector<2x8xf32>
    %130 = vector.multi_reduction <add>, %129, %cst_25 [2] : vector<2x8x32xf32> to vector<2x8xf32>
    %131 = vector.shape_cast %130 : vector<2x8xf32> to vector<2x8x1xf32>
    %cst_26 = arith.constant 3.200000e+01 : f32
    %132 = vector.broadcast %cst_26 : f32 to vector<2x8x1xf32>
    %133 = arith.divf %131, %132 : vector<2x8x1xf32>
    %134 = vector.broadcast %133 : vector<2x8x1xf32> to vector<2x8x32xf32>
    %135 = arith.subf %129, %134 : vector<2x8x32xf32>
    %136 = arith.mulf %135, %135 : vector<2x8x32xf32>
    %cst_27 = arith.constant dense<0.000000e+00> : vector<2x8xf32>
    %137 = vector.multi_reduction <add>, %136, %cst_27 [2] : vector<2x8x32xf32> to vector<2x8xf32>
    %138 = vector.shape_cast %137 : vector<2x8xf32> to vector<2x8x1xf32>
    %cst_28 = arith.constant 3.200000e+01 : f32
    %139 = vector.broadcast %cst_28 : f32 to vector<2x8x1xf32>
    %140 = arith.divf %138, %139 : vector<2x8x1xf32>
    %141 = vector.broadcast %133 : vector<2x8x1xf32> to vector<2x8x32xf32>
    %142 = arith.subf %129, %141 : vector<2x8x32xf32>
    %cst_29 = arith.constant 9.99999974E-6 : f32
    %143 = vector.broadcast %cst_29 : f32 to vector<2x8x1xf32>
    %144 = arith.addf %140, %143 : vector<2x8x1xf32>
    %145 = math.rsqrt %144 : vector<2x8x1xf32>
    %146 = vector.broadcast %145 : vector<2x8x1xf32> to vector<2x8x32xf32>
    %147 = arith.mulf %142, %146 : vector<2x8x32xf32>
    %148 = vector.shape_cast %6 : vector<1x32xf32> to vector<1x1x32xf32>
    %149 = vector.broadcast %148 : vector<1x1x32xf32> to vector<2x8x32xf32>
    %150 = arith.mulf %147, %149 : vector<2x8x32xf32>
    %151 = vector.shape_cast %7 : vector<1x32xf32> to vector<1x1x32xf32>
    %152 = vector.broadcast %151 : vector<1x1x32xf32> to vector<2x8x32xf32>
    %153 = arith.addf %150, %152 : vector<2x8x32xf32>
    %154 = vector.shape_cast %153 : vector<2x8x32xf32> to vector<16x32xf32>
    %c0_30 = arith.constant 0 : index
    %c0_31 = arith.constant 0 : index
    %155 = vector.load %arg5[%c0_30, %c0_31] : memref<32x128xf32, #tpu.memory_space<vmem>>, vector<32x128xf32>
    %cst_32 = arith.constant dense<0.000000e+00> : vector<16x128xf32>
    %156 = tpu.matmul %154, %155, %cst_32 {dimension_numbers = #tpu.dot_dimension_numbers<[1], [0], [0], [1], [0, 0, 1, 1], [], []>} : vector<16x32xf32>, vector<32x128xf32>, vector<16x128xf32> -> vector<16x128xf32>
    %157 = vector.broadcast %8 : vector<1x128xf32> to vector<16x128xf32>
    %158 = arith.addf %156, %157 : vector<16x128xf32>
    %cst_33 = arith.constant 5.000000e-01 : f32
    %159 = vector.broadcast %cst_33 : f32 to vector<16x128xf32>
    %160 = arith.mulf %159, %158 : vector<16x128xf32>
    %cst_34 = arith.constant 1.41421354 : f32
    %161 = vector.broadcast %cst_34 : f32 to vector<16x128xf32>
    %162 = arith.divf %158, %161 : vector<16x128xf32>
    %163 = math.erf %162 : vector<16x128xf32>
    %cst_35 = arith.constant 1.000000e+00 : f32
    %164 = vector.broadcast %cst_35 : f32 to vector<16x128xf32>
    %165 = arith.addf %164, %163 : vector<16x128xf32>
    %166 = arith.mulf %160, %165 : vector<16x128xf32>
    %c0_36 = arith.constant 0 : index
    %c0_37 = arith.constant 0 : index
    %167 = vector.load %arg6[%c0_36, %c0_37] : memref<128x32xf32, #tpu.memory_space<vmem>>, vector<128x32xf32>
    %cst_38 = arith.constant dense<0.000000e+00> : vector<16x32xf32>
    %168 = tpu.matmul %166, %167, %cst_38 {dimension_numbers = #tpu.dot_dimension_numbers<[1], [0], [0], [1], [0, 0, 1, 1], [], []>} : vector<16x128xf32>, vector<128x32xf32>, vector<16x32xf32> -> vector<16x32xf32>
    %169 = vector.broadcast %9 : vector<1x32xf32> to vector<16x32xf32>
    %170 = arith.addf %168, %169 : vector<16x32xf32>
    %171 = vector.shape_cast %170 : vector<16x32xf32> to vector<2x8x32xf32>
    %172 = arith.addf %129, %171 : vector<2x8x32xf32>
    %c0_39 = arith.constant 0 : index
    %c0_40 = arith.constant 0 : index
    %c0_41 = arith.constant 0 : index
    %173 = vector.load %arg7[%c0_39, %c0_40, %c0_41] : memref<2x8x32xf32, #tpu.memory_space<vmem>>, vector<2x8x32xf32>
    tpu.vector_store %arg7[%c0_39, %c0_40, %c0_41], %172 {strides = array<i32>} : memref<2x8x32xf32, #tpu.memory_space<vmem>>, vector<2x8x32xf32>,
    return
  }
  func.func @transform_0(%arg0: i32) -> (i32, i32, i32) {
    %c0_i32 = arith.constant 0 : i32
    %c0_i32_0 = arith.constant 0 : i32
    %c0_i32_1 = arith.constant 0 : i32
    %c0_i32_2 = arith.constant 0 : i32
    return %c0_i32, %c0_i32_0, %c0_i32_1 : i32, i32, i32
  }
  func.func @transform_1(%arg0: i32) -> (i32, i32) {
    %c0_i32 = arith.constant 0 : i32
    %c0_i32_0 = arith.constant 0 : i32
    %c0_i32_1 = arith.constant 0 : i32
    return %c0_i32, %c0_i32_0 : i32, i32
  }
  func.func @transform_2(%arg0: i32) -> (i32, i32) {
    %c0_i32 = arith.constant 0 : i32
    %c0_i32_0 = arith.constant 0 : i32
    %c0_i32_1 = arith.constant 0 : i32
    return %c0_i32, %c0_i32_0 : i32, i32
  }
  func.func @transform_3(%arg0: i32) -> (i32, i32) {
    %c0_i32 = arith.constant 0 : i32
    %c0_i32_0 = arith.constant 0 : i32
    %c0_i32_1 = arith.constant 0 : i32
    return %c0_i32, %c0_i32_0 : i32, i32
  }
  func.func @transform_4(%arg0: i32) -> (i32, i32) {
    %c0_i32 = arith.constant 0 : i32
    %c0_i32_0 = arith.constant 0 : i32
    %c0_i32_1 = arith.constant 0 : i32
    return %c0_i32, %c0_i32_0 : i32, i32
  }
  func.func @transform_5(%arg0: i32) -> (i32, i32) {
    %c0_i32 = arith.constant 0 : i32
    %c0_i32_0 = arith.constant 0 : i32
    %c0_i32_1 = arith.constant 0 : i32
    return %c0_i32, %c0_i32_0 : i32, i32
  }
  func.func @transform_6(%arg0: i32) -> (i32, i32, i32) {
    %c0_i32 = arith.constant 0 : i32
    %c0_i32_0 = arith.constant 0 : i32
    %c0_i32_1 = arith.constant 0 : i32
    %c0_i32_2 = arith.constant 0 : i32
    return %c0_i32, %c0_i32_0, %c0_i32_1 : i32, i32, i32
  }
}

</mosaic_0001>

<bundles_post_ra>
// kernel: tpu_custom_call.1
= control target key start
LH: loop header
LB: loop body
LE: loop exit
PB: predicated region body
PF: predicated region fallthrough
CT: control target
= control target key end

     0   :  { %vm27_vm0 = vcmask 261120   ;;  %s2709_s0 = inlined_call_operand.vmem [shape: f32[2,8,32], index: 0, kind: input, shape index: {}]   ;;  %s2710_s1 = inlined_call_operand.vmem [shape: f32[8,128], index: 1, kind: input, shape index: {}]   ;;  %s2711_s2 = inlined_call_operand.vmem [shape: f32[32,96], index: 2, kind: input, shape index: {}]   ;;  %s2712_s3 = inlined_call_operand.vmem [shape: f32[32,32], index: 3, kind: input, shape index: {}]   ;;  %s2713_s4 = inlined_call_operand.vmem [shape: f32[32,128], index: 4, kind: input, shape index: {}]   ;;  %s2714_s5 = inlined_call_operand.vmem [shape: f32[128,32], index: 5, kind: input, shape index: {}]   ;;  %s2715_s6 = inlined_call_operand.hbm [shape: f32[2,8,32], index: 6, kind: output, shape index: {}]  }
   0x1   :  { %v2344_v0 = vld [vmem:[%s2709_s0] sm:$0xff]  ;;  %v2349_v1 = vld [vmem:[%s2709_s0 + $0x8] sm:$0xff] }
   0x2   :  { %11 = vsyncpa [#allocation3], 0  ;;  %v28_v2 = vsel %vm27_vm0, %v2344_v0, 0.0  ;;  %v31_v3 = vsel %vm27_vm0, %v2349_v1, 0.0  ;;  %v67_v14 = vld [vmem:[%s2711_s2] sm:$0xff]  ;;  %v68_v15 = vld [vmem:[%s2711_s2 + $0x8] sm:$0xff]  ;;  %v55_v22 = vlaneseq }
   0x3   :  { %29 = vadd.xlane.f32.xlu0 %v28_v2  ;;  %v69_v16 = vld [vmem:[%s2711_s2 + $0x10] sm:$0xff]  ;;  %v2158_v17 = vpack.c.bf16 %v68_v15, %v67_v14  ;;  %v70_v18 = vld [vmem:[%s2711_s2 + $0x18] sm:$0xff]  ;;  %v2378_v29 = vld [vmem:[%s2710_s1] sm:$0xff]  ;;  %v2294_v42 = vmov 0.0   ;;  %vm2295_vm1 = vmmov 0   ;;  %s2296_s1 = smov 112  }
   0x4   :  { %v2162_v19 = vpack.c.bf16 %v70_v18, %v69_v16  ;;  %v2372_v26 = vshrl.u32 %v55_v22, 7  ;;  %2031 = vmatprep.subr.mxu0 %v2294_v42  ;;  %2033 = vmatprep.mubr.msk.f32.mxu0 %vm2295_vm1, %v2294_v42  ;;  %s2297_s9 = smov 120   ;;  %s2298_s10 = smov 104   ;;  %vm172_vm2 = vcmask 64512   ;;  %v790_v62 = vand.u32 127, %v55_v22 }
   0x5   :  { %2159 = vmatprep.subr.bf16.mxu1 %v2158_v17  ;;  %s2299_s11 = smov 96   ;;  %s2300_s12 = smov 64   ;;  %vm1562_vm4 = vcmask 130048   ;;  %vm1565_vm5 = vcmask 195584  }
   0x6   :  { %2161 = vmatpush3.bf16.msra.mxu1 %v2158_v17  ;;  %v57_v28 = vsub.s32 0, %v2372_v26  ;;  %v63_v30 = vsub.s32 1, %v2372_v26  ;;  %v73_v41 = vsub.s32 2, %v2372_v26  ;;  %v791_v63 = vsub.s32 %v790_v62, %v2372_v26  ;;  %s2301_s13 = smov 8   ;;  %s2302_s22 = smov 16  }
   0x7   :  { %32 = vadd.xlane.f32.xlu0 %v31_v3  ;;  %2163 = vmatprep.subr.bf16.mxu1 %v2162_v19  ;;  %vm2474_vm3 = vcmp.le.s32.totalorder %v790_v62, %v2372_v26  ;;  %s2303_s23 = smov 24  }
   0x8   :  { %v58_v31 = vrot.slane %v2378_v29, %v57_v28  ;;  %v64_v34 = vrot.slane %v2378_v29, %v63_v30  ;;  %v74_v43 = vrot.slane %v2378_v29, %v73_v41  ;;  %v792_v2 = vcvt.s32.f32 %v791_v63 }
   0xa   :  { %2165 = vmatpush3.bf16.msra.mxu1 %v2162_v19  ;;  %v794_v3 = vmul.f32 0.25, %v792_v2 }
   0xb   :  { %2021 = vmatprep.subr.mxu1 %v2294_v42 }
  0x90   :  { %v30_v4 = vpop.xlane.xlu0 %29 }
  0x91   :  { %v35_v5 = vmul.f32 0.03125, %v30_v4 }
  0x93   :  { %v37_v6 = vsub.f32 %v2344_v0, %v35_v5 }
  0x94   :  { %v33_v7 = vpop.xlane.xlu0 %32 }
  0x95   :  { %v36_v8 = vmul.f32 0.03125, %v33_v7  ;;  %v39_v9 = vmul.f32 %v37_v6, %v37_v6 }
  0x97   :  { %v38_v10 = vsub.f32 %v2349_v1, %v36_v8  ;;  %v41_v11 = vsel %vm27_vm0, %v39_v9, 0.0 }
  0x98   :  { %42 = vadd.xlane.f32.xlu1 %v41_v11  ;;  %v795_v11 = vmul.f32 0.0625, %v792_v2 }
  0x99   :  { %v40_v12 = vmul.f32 %v38_v10, %v38_v10 }
  0x9b   :  { %v44_v13 = vsel %vm27_vm0, %v40_v12, 0.0  ;;  %v796_v12 = vmul.f32 0.015625, %v792_v2 }
  0x9c   :  { %45 = vadd.xlane.f32.xlu1 %v44_v13 }
 0x125   :  { %v43_v20 = vpop.xlane.xlu1 %42 }
 0x126   :  { %v47_v21 = vmul.f32 0.03125, %v43_v20 }
 0x128   :  { %v49_v23 = vadd.f32 1e-05, %v47_v21  ;;  %v797_v21 = vmul.f32 0.00390625, %v792_v2 }
 0x129   :  { %v46_v24 = vpop.xlane.xlu1 %45 }
 0x12a   :  { %2226 = vrsqrt.f32 %v49_v23  ;;  %v48_v25 = vmul.f32 0.03125, %v46_v24 }
 0x12c   :  { %v50_v27 = vadd.f32 1e-05, %v48_v25 }
 0x12e   :  { %2228 = vrsqrt.f32 %v50_v27 }
 0x134   :  { %v2227_v32 = vpop.eup %2226 }
 0x135   :  { %v53_v33 = vmul.f32 %v2227_v32, %v37_v6 }
 0x137   :  { %v59_v35 = vmul.f32 %v58_v31, %v53_v33 }
 0x138   :  { %v2229_v36 = vpop.eup %2228 }
 0x139   :  { %v54_v37 = vmul.f32 %v2229_v36, %v38_v10  ;;  %v65_v38 = vadd.f32 %v64_v34, %v59_v35 }
 0x13b   :  { %v60_v39 = vmul.f32 %v58_v31, %v54_v37  ;;  %2018 = vmatprep.mubr.msk.f32.mxu1 %vm27_vm0, %v65_v38 }
 0x13d   :  { %v66_v40 = vadd.f32 %v64_v34, %v60_v39 }
 0x13f   :  { %2019 = vmatmul.mubr.msk.f32.vlgmr.msra.gmra.mrb[0].mxu1 %vm27_vm0, %v66_v40 }
 0x140   :  { %2023 = vmatprep.mubr.msk.f32.mxu1 %vm2295_vm1, %v2294_v42 }
 0x212   :  { %v2020_v44 = vpop.f32.mrb[0].mxu1 }
 0x213   :  { %v147_v45 = vpop.f32.mrb[1].mxu1  ;;  %v2397_v47 = vadd.f32 %v2020_v44, %v74_v43 }
 0x214   :  { %v2393_v46 = vadd.f32 %v147_v45, %v74_v43 }
 0x216   :  { %162 = vrot.lane.b32.xlu1 %v2393_v46, %s2296_s1  ;;  %158 = vrot.lane.b32.xlu0 %v2393_v46, %s2297_s9 }
 0x21a   :  { %166 = vrot.lane.b32.xlu1 %v2393_v46, %s2298_s10  ;;  %164 = vrot.lane.b32.xlu0 %v2397_v47, %s2296_s1 }
 0x21e   :  { %160 = vrot.lane.b32.xlu1 %v2397_v47, %s2297_s9  ;;  %170 = vrot.lane.b32.xlu0 %v2393_v46, %s2299_s11 }
 0x222   :  { %168 = vrot.lane.b32.xlu1 %v2397_v47, %s2298_s10 }
 0x288   :  { %v2404_v48 = vpop.permute.xlu1 %162  ;;  %v2406_v49 = vpop.permute.xlu0 %158 }
 0x289   :  { %323 = vrot.lane.b32.xlu0 %v2404_v48, %s2299_s11  ;;  %247 = vrot.lane.b32.xlu1 %v2406_v49, %s2299_s11 }
 0x28c   :  { %v2410_v50 = vpop.permute.xlu1 %166  ;;  %v2412_v51 = vpop.permute.xlu0 %164 }
 0x28d   :  { %475 = vrot.lane.b32.xlu0 %v2397_v47, %s2299_s11  ;;  %399 = vrot.lane.b32.xlu1 %v2410_v50, %s2299_s11 }
 0x290   :  { %v2416_v52 = vpop.permute.xlu1 %160  ;;  %v171_v53 = vpop.permute.xlu0 %170 }
 0x291   :  { %551 = vrot.lane.b32.xlu1 %v2416_v52, %s2299_s11  ;;  %627 = vrot.lane.b32.xlu0 %v2412_v51, %s2299_s11 }
 0x292   :  { %2022 = vmatpush3.xpose.msk.msra.mxu1 %vm172_vm2, %v171_v53 }
 0x293   :  { %2026 = vmatprep.subr.mxu1 %v2294_v42 }
 0x294   :  { %v2422_v54 = vpop.permute.xlu1 %168 }
 0x295   :  { %2024 = vmatmul.mubr.msk.f32.vlgmr.msra.gmra.mrb[2].mxu1 %vm172_vm2, %v2393_v46  ;;  %703 = vrot.lane.b32.xlu1 %v2422_v54, %s2299_s11 }
 0x296   :  { %2028 = vmatprep.mubr.msk.f32.mxu1 %vm2295_vm1, %v2294_v42 }
 0x2fb   :  { %v248_v55 = vpop.permute.xlu1 %247  ;;  %v324_v56 = vpop.permute.xlu0 %323 }
 0x2fc   :  { %2027 = vmatpush3.xpose.msk.msra.mxu1 %vm172_vm2, %v248_v55  ;;  %2032 = vmatpush3.xpose.msk.msra.mxu0 %vm172_vm2, %v324_v56 }
 0x2fd   :  { %2036 = vmatprep.subr.mxu1 %v2294_v42  ;;  %2041 = vmatprep.subr.mxu0 %v2294_v42 }
 0x2ff   :  { %v400_v57 = vpop.permute.xlu1 %399  ;;  %2029 = vmatmul.mubr.msk.f32.vlgmr.msra.gmra.mrb[4].mxu1 %vm172_vm2, %v2406_v49  ;;  %2034 = vmatmul.mubr.msk.f32.vlgmr.msra.gmra.mrb[0].mxu0 %vm172_vm2, %v2404_v48  ;;  %v476_v58 = vpop.permute.xlu0 %475 }
 0x300   :  { %2037 = vmatpush3.xpose.msk.msra.mxu1 %vm172_vm2, %v400_v57  ;;  %2042 = vmatpush3.xpose.msk.msra.mxu0 %vm172_vm2, %v476_v58 }
 0x301   :  { %2038 = vmatprep.mubr.msk.f32.mxu1 %vm2295_vm1, %v2294_v42  ;;  %2043 = vmatprep.mubr.msk.f32.mxu0 %vm2295_vm1, %v2294_v42 }
 0x302   :  { %2046 = vmatprep.subr.mxu1 %v2294_v42  ;;  %2051 = vmatprep.subr.mxu0 %v2294_v42 }
 0x303   :  { %v552_v59 = vpop.permute.xlu1 %551  ;;  %2039 = vmatmul.mubr.msk.f32.vlgmr.msra.gmra.mrb[6].mxu1 %vm172_vm2, %v2410_v50  ;;  %2044 = vmatmul.mubr.msk.f32.vlgmr.msra.gmra.mrb[2].mxu0 %vm172_vm2, %v2397_v47  ;;  %v628_v60 = vpop.permute.xlu0 %627 }
 0x304   :  { %2047 = vmatpush3.xpose.msk.msra.mxu1 %vm172_vm2, %v552_v59  ;;  %2052 = vmatpush3.xpose.msk.msra.mxu0 %vm172_vm2, %v628_v60 }
 0x305   :  { %2048 = vmatprep.mubr.msk.f32.mxu1 %vm2295_vm1, %v2294_v42  ;;  %2053 = vmatprep.mubr.msk.f32.mxu0 %vm2295_vm1, %v2294_v42 }
 0x306   :  { %2056 = vmatprep.subr.mxu1 %v2294_v42  ;;  %2061 = vmatprep.subr.mxu0 %v2294_v42 }
 0x307   :  { %v704_v61 = vpop.permute.xlu1 %703  ;;  %2049 = vmatmul.mubr.msk.f32.vlgmr.msra.gmra.mrb[8].mxu1 %vm172_vm2, %v2416_v52  ;;  %2054 = vmatmul.mubr.msk.f32.vlgmr.msra.gmra.mrb[4].mxu0 %vm172_vm2, %v2412_v51 }
 0x308   :  { %2057 = vmatpush3.xpose.msk.msra.mxu1 %vm172_vm2, %v704_v61  ;;  %2058 = vmatprep.mubr.msk.f32.mxu1 %vm2295_vm1, %v2294_v42 }
 0x309   :  { %2066 = vmatprep.subr.mxu1 %v2294_v42  ;;  %2063 = vmatprep.mubr.msk.f32.mxu0 %vm2295_vm1, %v2294_v42 }
 0x30b   :  { %2059 = vmatmul.mubr.msk.f32.vlgmr.msra.gmra.mrb[10].mxu1 %vm172_vm2, %v2422_v54 }
 0x30c   :  { %2068 = vmatprep.mubr.msk.f32.mxu1 %vm2295_vm1, %v2294_v42 }
 0x368   :  { %v243_v4 = vpop.f32.mrb[2].mxu1 }
 0x369   :  { %v779_v5 = vmul.f32 0.35355338, %v243_v4  ;;  %v2025_v6 = vpop.f32.mrb[3].mxu1 }
 0x36b   :  { %v798_v8 = vadd.f32 %v794_v3, %v779_v5 }
 0x36d   :  { %v808_v9 = vsel %vm2474_vm3, %v798_v8, -1e+30 }
 0x36e   :  { %v816_v10 = vsel %vm172_vm2, %v808_v9, -inf }
 0x36f   :  { %817 = vmax.xlane.f32.xlu0 %v816_v10 }
 0x3d2   :  { %v319_v13 = vpop.f32.mrb[4].mxu1  ;;  %v395_v14 = vpop.f32.mrb[0].mxu0 }
 0x3d3   :  { %v780_v15 = vmul.f32 0.35355338, %v319_v13  ;;  %v781_v16 = vmul.f32 0.35355338, %v395_v14  ;;  %v2030_v17 = vpop.f32.mrb[5].mxu1  ;;  %v2035_v18 = vpop.f32.mrb[1].mxu0 }
 0x3d5   :  { %v799_v19 = vadd.f32 %v795_v11, %v780_v15  ;;  %v800_v20 = vadd.f32 %v796_v12, %v781_v16 }
 0x3d6   :  { %v471_v22 = vpop.f32.mrb[6].mxu1  ;;  %v547_v23 = vpop.f32.mrb[2].mxu0 }
 0x3d7   :  { %v782_v24 = vmul.f32 0.35355338, %v471_v22  ;;  %v783_v25 = vmul.f32 0.35355338, %v547_v23  ;;  %v2040_v27 = vpop.f32.mrb[7].mxu1  ;;  %v2045_v28 = vpop.f32.mrb[3].mxu0 }
 0x3d8   :  { %v809_v30 = vsel %vm2474_vm3, %v799_v19, -1e+30  ;;  %v810_v31 = vsel %vm2474_vm3, %v800_v20, -1e+30 }
 0x3d9   :  { %v801_v32 = vadd.f32 %v797_v21, %v782_v24  ;;  %v819_v33 = vsel %vm172_vm2, %v809_v30, -inf  ;;  %v822_v34 = vsel %vm172_vm2, %v810_v31, -inf  ;;  %v802_v35 = vadd.f32 %v794_v3, %v783_v25 }
 0x3da   :  { %820 = vmax.xlane.f32.xlu1 %v819_v33  ;;  %823 = vmax.xlane.f32.xlu0 %v822_v34  ;;  %v623_v36 = vpop.f32.mrb[8].mxu1  ;;  %v699_v37 = vpop.f32.mrb[4].mxu0 }
 0x3db   :  { %v784_v38 = vmul.f32 0.35355338, %v623_v36  ;;  %v785_v39 = vmul.f32 0.35355338, %v699_v37  ;;  %v2050_v40 = vpop.f32.mrb[9].mxu1  ;;  %v2055_v41 = vpop.f32.mrb[5].mxu0 }
 0x3dc   :  { %v811_v43 = vsel %vm2474_vm3, %v801_v32, -1e+30  ;;  %v812_v56 = vsel %vm2474_vm3, %v802_v35, -1e+30 }
 0x3dd   :  { %v803_v44 = vadd.f32 %v795_v11, %v784_v38  ;;  %v825_v45 = vsel %vm172_vm2, %v811_v43, -inf  ;;  %v804_v53 = vadd.f32 %v796_v12, %v785_v39  ;;  %v828_v60 = vsel %vm172_vm2, %v812_v56, -inf }
 0x3de   :  { %826 = vmax.xlane.f32.xlu0 %v825_v45  ;;  %v775_v55 = vpop.f32.mrb[10].mxu1 }
 0x3df   :  { %v2060_v57 = vpop.f32.mrb[11].mxu1  ;;  %v813_v58 = vsel %vm2474_vm3, %v803_v44, -1e+30  ;;  %v814_v61 = vsel %vm2474_vm3, %v804_v53, -1e+30 }
 0x3e0   :  { %v831_v59 = vsel %vm172_vm2, %v813_v58, -inf  ;;  %v834_v62 = vsel %vm172_vm2, %v814_v61, -inf  ;;  %v786_v4 = vmul.f32 0.35355338, %v775_v55 }
 0x3e1   :  { %832 = vmax.xlane.f32.xlu1 %v831_v59 }
 0x3e2   :  { %829 = vmax.xlane.f32.xlu0 %v828_v60  ;;  %v805_v5 = vadd.f32 %v797_v21, %v786_v4 }
 0x3e4   :  { %v2507_v6 = vsel %vm2474_vm3, %v805_v5, -1e+30 }
 0x3e6   :  { %835 = vmax.xlane.f32.xlu0 %v834_v62 }
 0x3f2   :  { %1004 = vrot.lane.b32.xlu1 %v2406_v49, %s2300_s12  ;;  %v837_v49 = vsel %vm172_vm2, %v2507_v6, -inf }
 0x3f6   :  { %1080 = vrot.lane.b32.xlu1 %v2404_v48, %s2300_s12 }
 0x3fc   :  { %928 = vrot.lane.b32.xlu0 %v2393_v46, %s2300_s12  ;;  %v818_v63 = vpop.xlane.xlu0 %817 }
 0x3fd   :  { %v840_v2 = vsub.f32 %v808_v9, %v818_v63 }
 0x3ff   :  { %v848_v3 = vmul.f32 1.442695, %v840_v2 }
 0x401   :  { %2230 = vpow2.f32 %v848_v3 }
 0x40b   :  { %v2509_v8 = vpop.eup %2230 }
 0x40c   :  { %v864_v48 = vsel %vm172_vm2, %v2509_v8, 0.0 }
 0x41a   :  { %838 = vmax.xlane.f32.xlu1 %v837_v49 }
 0x41b   :  { %865 = vadd.xlane.f32.xlu0 %v864_v48 }
 0x42b   :  { %1156 = vrot.lane.b32.xlu1 %v2410_v50, %s2300_s12 }
 0x467   :  { %v821_v46 = vpop.xlane.xlu1 %820  ;;  %v824_v9 = vpop.xlane.xlu0 %823 }
 0x468   :  { %v841_v10 = vsub.f32 %v809_v30, %v821_v46  ;;  %v842_v11 = vsub.f32 %v810_v31, %v824_v9 }
 0x46a   :  { %v850_v7 = vmul.f32 1.442695, %v841_v10  ;;  %v852_v12 = vmul.f32 1.442695, %v842_v11 }
 0x46b   :  { %v827_v13 = vpop.xlane.xlu0 %826 }
 0x46c   :  { %2232 = vpow2.f32 %v850_v7  ;;  %v843_v14 = vsub.f32 %v811_v43, %v827_v13 }
 0x46d   :  { %2234 = vpow2.f32 %v852_v12 }
 0x46e   :  { %v854_v15 = vmul.f32 1.442695, %v843_v14  ;;  %v833_v16 = vpop.xlane.xlu1 %832 }
 0x46f   :  { %v845_v17 = vsub.f32 %v813_v58, %v833_v16  ;;  %v830_v18 = vpop.xlane.xlu0 %829 }
 0x470   :  { %2236 = vpow2.f32 %v854_v15  ;;  %v844_v19 = vsub.f32 %v812_v56, %v830_v18 }
 0x471   :  { %v858_v20 = vmul.f32 1.442695, %v845_v17 }
 0x472   :  { %v856_v21 = vmul.f32 1.442695, %v844_v19  ;;  %v1005_v22 = vpop.permute.xlu1 %1004 }
 0x473   :  { %2238 = vpow2.f32 %v858_v20  ;;  %v836_v50 = vpop.xlane.xlu0 %835  ;;  %2067 = vmatpush3.msra.mxu1 %v1005_v22 }
 0x474   :  { %2240 = vpow2.f32 %v856_v21  ;;  %v846_v23 = vsub.f32 %v814_v61, %v836_v50  ;;  %2076 = vmatprep.subr.mxu1 %v2294_v42 }
 0x476   :  { %v2518_v24 = vpop.eup %2232  ;;  %v860_v25 = vmul.f32 1.442695, %v846_v23  ;;  %v1081_v40 = vpop.permute.xlu1 %1080 }
 0x477   :  { %v2520_v27 = vpop.eup %2234  ;;  %v929_v28 = vpop.permute.xlu0 %928  ;;  %v867_v30 = vsel %vm172_vm2, %v2518_v24, 0.0 }
 0x478   :  { %2242 = vpow2.f32 %v860_v25  ;;  %868 = vadd.xlane.f32.xlu1 %v867_v30  ;;  %v870_v31 = vsel %vm172_vm2, %v2520_v27, 0.0  ;;  %2062 = vmatpush3.msra.mxu0 %v929_v28 }
 0x479   :  { %871 = vadd.xlane.f32.xlu0 %v870_v31  ;;  %2071 = vmatprep.subr.mxu0 %v2294_v42 }
 0x47a   :  { %v2527_v32 = vpop.eup %2236 }
 0x47b   :  { %v873_v33 = vsel %vm172_vm2, %v2527_v32, 0.0 }
 0x47c   :  { %874 = vadd.xlane.f32.xlu1 %v873_v33 }
 0x47d   :  { %v2531_v34 = vpop.eup %2238 }
 0x47e   :  { %v2533_v35 = vpop.eup %2240  ;;  %v879_v36 = vsel %vm172_vm2, %v2531_v34, 0.0 }
 0x47f   :  { %v876_v37 = vsel %vm172_vm2, %v2533_v35, 0.0 }
 0x480   :  { %880 = vadd.xlane.f32.xlu1 %v879_v36  ;;  %877 = vadd.xlane.f32.xlu0 %v876_v37 }
 0x482   :  { %v2539_v38 = vpop.eup %2242 }
 0x483   :  { %v882_v39 = vsel %vm172_vm2, %v2539_v38, 0.0 }
 0x484   :  { %883 = vadd.xlane.f32.xlu0 %v882_v39 }
 0x491   :  { %1308 = vrot.lane.b32.xlu1 %v2416_v52, %s2300_s12 }
 0x49a   :  { %1232 = vrot.lane.b32.xlu0 %v2397_v47, %s2300_s12 }
 0x49e   :  { %1384 = vrot.lane.b32.xlu0 %v2412_v51, %s2300_s12 }
 0x4a7   :  { %v839_v41 = vpop.xlane.xlu1 %838 }
 0x4a8   :  { %v847_v43 = vsub.f32 %v2507_v6, %v839_v41  ;;  %v866_v44 = vpop.xlane.xlu0 %865 }
 0x4a9   :  { %2244 = vrcp.f32 %v866_v44 }
 0x4aa   :  { %v862_v45 = vmul.f32 1.442695, %v847_v43 }
 0x4ab   :  { %v1157_v58 = vpop.permute.xlu1 %1156 }
 0x4ac   :  { %2246 = vpow2.f32 %v862_v45 }
 0x4b3   :  { %v2245_v53 = vpop.eup %2244 }
 0x4b4   :  { %v896_v55 = vmul.f32 %v2245_v53, %v866_v44 }
 0x4b6   :  { %v2550_v56 = vpop.eup %2246  ;;  %v904_v57 = vsub.f32 2.0, %v896_v55  ;;  %v1570_v55 = vld [vmem:[%s2712_s3 + $0x10] sm:$0xff] }
 0x4b7   :  { %v885_v52 = vsel %vm172_vm2, %v2550_v56, 0.0 }
 0x4b8   :  { %v912_v47 = vmul.f32 %v2245_v53, %v904_v57  ;;  %886 = vadd.xlane.f32.xlu1 %v885_v52  ;;  %v1569_v53 = vld [vmem:[%s2712_s3 + $0x8] sm:$0xff]  ;;  %v1571_v52 = vld [vmem:[%s2712_s3 + $0x18] sm:$0xff] }
 0x4ba   :  { %v920_v51 = vmul.f32 %v2509_v8, %v912_v47  ;;  %v2170_v47 = vpack.c.bf16 %v1571_v52, %v1570_v55 }
 0x4bc   :  { %2064 = vmatmul.mubr.msk.f32.vlgmr.msra.gmra.mrb[6].mxu0 %vm172_vm2, %v920_v51 }
 0x4bd   :  { %2072 = vmatpush3.msra.mxu0 %v1081_v40  ;;  %2073 = vmatprep.mubr.msk.f32.mxu0 %vm2295_vm1, %v2294_v42 }
 0x4be   :  { %2081 = vmatprep.subr.mxu0 %v2294_v42 }
 0x4c9   :  { %1460 = vrot.lane.b32.xlu1 %v2422_v54, %s2300_s12 }
 0x505   :  { %v869_v59 = vpop.xlane.xlu1 %868 }
 0x506   :  { %2248 = vrcp.f32 %v869_v59  ;;  %v872_v60 = vpop.xlane.xlu0 %871 }
 0x507   :  { %2250 = vrcp.f32 %v872_v60 }
 0x509   :  { %v875_v61 = vpop.xlane.xlu1 %874 }
 0x50a   :  { %2252 = vrcp.f32 %v875_v61 }
 0x50d   :  { %v881_v62 = vpop.xlane.xlu1 %880  ;;  %v878_v63 = vpop.xlane.xlu0 %877 }
 0x50e   :  { %2254 = vrcp.f32 %v881_v62 }
 0x50f   :  { %2256 = vrcp.f32 %v878_v63 }
 0x510   :  { %v2249_v2 = vpop.eup %2248 }
 0x511   :  { %v2251_v3 = vpop.eup %2250  ;;  %v897_v4 = vmul.f32 %v2249_v2, %v869_v59  ;;  %v884_v5 = vpop.xlane.xlu0 %883 }
 0x512   :  { %v898_v6 = vmul.f32 %v2251_v3, %v872_v60  ;;  %2258 = vrcp.f32 %v884_v5  ;;  %v1309_v50 = vpop.permute.xlu1 %1308 }
 0x513   :  { %v905_v8 = vsub.f32 2.0, %v897_v4 }
 0x514   :  { %v2253_v49 = vpop.eup %2252  ;;  %v906_v54 = vsub.f32 2.0, %v898_v6 }
 0x515   :  { %v913_v48 = vmul.f32 %v2249_v2, %v905_v8  ;;  %v899_v46 = vmul.f32 %v2253_v49, %v875_v61  ;;  %v1233_v17 = vpop.permute.xlu0 %1232 }
 0x516   :  { %v914_v9 = vmul.f32 %v2251_v3, %v906_v54 }
 0x517   :  { %v921_v10 = vmul.f32 %v2518_v24, %v913_v48  ;;  %v907_v11 = vsub.f32 2.0, %v899_v46 }
 0x518   :  { %v2255_v7 = vpop.eup %2254  ;;  %v922_v12 = vmul.f32 %v2520_v27, %v914_v9 }
 0x519   :  { %v2257_v13 = vpop.eup %2256  ;;  %v915_v14 = vmul.f32 %v2253_v49, %v907_v11  ;;  %v901_v15 = vmul.f32 %v2255_v7, %v881_v62  ;;  %2069 = vmatmul.mubr.msk.f32.vlgmr.msra.gmra.mrb[12].mxu1 %vm172_vm2, %v921_v10  ;;  %v1385_v31 = vpop.permute.xlu0 %1384 }
 0x51a   :  { %v900_v16 = vmul.f32 %v2257_v13, %v878_v63  ;;  %2074 = vmatmul.mubr.msk.f32.vlgmr.msra.gmra.mrb[8].mxu0 %vm172_vm2, %v922_v12  ;;  %2077 = vmatpush3.msra.mxu1 %v1157_v58 }
 0x51b   :  { %v923_v18 = vmul.f32 %v2527_v32, %v915_v14  ;;  %v909_v19 = vsub.f32 2.0, %v901_v15  ;;  %2082 = vmatpush3.msra.mxu0 %v1233_v17  ;;  %2078 = vmatprep.mubr.msk.f32.mxu1 %vm2295_vm1, %v2294_v42 }
 0x51c   :  { %v2259_v20 = vpop.eup %2258  ;;  %v908_v21 = vsub.f32 2.0, %v900_v16  ;;  %2086 = vmatprep.subr.mxu1 %v2294_v42  ;;  %2083 = vmatprep.mubr.msk.f32.mxu0 %vm2295_vm1, %v2294_v42 }
 0x51d   :  { %v917_v22 = vmul.f32 %v2255_v7, %v909_v19  ;;  %v902_v23 = vmul.f32 %v2259_v20, %v884_v5  ;;  %2079 = vmatmul.mubr.msk.f32.vlgmr.msra.gmra.mrb[14].mxu1 %vm172_vm2, %v923_v18  ;;  %2091 = vmatprep.subr.mxu0 %v2294_v42 }
 0x51e   :  { %v916_v24 = vmul.f32 %v2257_v13, %v908_v21  ;;  %2087 = vmatpush3.msra.mxu1 %v1309_v50  ;;  %2088 = vmatprep.mubr.msk.f32.mxu1 %vm2295_vm1, %v2294_v42  ;;  %v1574_v13 = vsub.s32 3, %v2372_v26 }
 0x51f   :  { %v925_v25 = vmul.f32 %v2531_v34, %v917_v22  ;;  %v910_v27 = vsub.f32 2.0, %v902_v23  ;;  %2096 = vmatprep.subr.mxu1 %v2294_v42 }
 0x520   :  { %v924_v28 = vmul.f32 %v2533_v35, %v916_v24  ;;  %v1575_v14 = vrot.slane %v2378_v29, %v1574_v13  ;;  %v1809_v13 = vld [vmem:[%s2714_s5 + $0x60] sm:$0xff] }
 0x521   :  { %v918_v30 = vmul.f32 %v2259_v20, %v910_v27  ;;  %2089 = vmatmul.mubr.msk.f32.vlgmr.msra.gmra.mrb[16].mxu1 %vm172_vm2, %v925_v25 }
 0x522   :  { %2084 = vmatmul.mubr.msk.f32.vlgmr.msra.gmra.mrb[10].mxu0 %vm172_vm2, %v924_v28  ;;  %2098 = vmatprep.mubr.msk.f32.mxu1 %vm2295_vm1, %v2294_v42 }
 0x523   :  { %v926_v32 = vmul.f32 %v2539_v38, %v918_v30  ;;  %2092 = vmatpush3.msra.mxu0 %v1385_v31  ;;  %2093 = vmatprep.mubr.msk.f32.mxu0 %vm2295_vm1, %v2294_v42  ;;  %v1568_v42 = vld [vmem:[%s2712_s3] sm:$0xff] }
 0x524   :  { %v2166_v57 = vpack.c.bf16 %v1569_v53, %v1568_v42  ;;  %v1802_v42 = vld [vmem:[%s2714_s5 + $0x28] sm:$0xff] }
 0x526   :  { %2094 = vmatmul.mubr.msk.f32.vlgmr.msra.gmra.mrb[12].mxu0 %vm172_vm2, %v926_v32  ;;  %v1697_v32 = vld [vmem:[%s2713_s4] sm:$0xff] }
 0x545   :  { %v887_v33 = vpop.xlane.xlu1 %886 }
 0x546   :  { %2260 = vrcp.f32 %v887_v33 }
 0x549   :  { %v1461_v34 = vpop.permute.xlu1 %1460 }
 0x54a   :  { %2097 = vmatpush3.msra.mxu1 %v1461_v34 }
 0x54b   :  { %2167 = vmatprep.subr.bf16.mxu1 %v2166_v57 }
 0x550   :  { %v2261_v35 = vpop.eup %2260 }
 0x551   :  { %v903_v36 = vmul.f32 %v2261_v35, %v887_v33  ;;  %v1698_v33 = vld [vmem:[%s2713_s4 + $0x8] sm:$0xff] }
 0x552   :  { %v2174_v34 = vpack.c.bf16 %v1698_v33, %v1697_v32 }
 0x553   :  { %v911_v37 = vsub.f32 2.0, %v903_v36  ;;  %v1700_v36 = vld [vmem:[%s2713_s4 + $0x18] sm:$0xff] }
 0x555   :  { %v919_v39 = vmul.f32 %v2261_v35, %v911_v37  ;;  %v1699_v35 = vld [vmem:[%s2713_s4 + $0x10] sm:$0xff] }
 0x556   :  { %v2178_v37 = vpack.c.bf16 %v1700_v36, %v1699_v35  ;;  %v1815_v36 = vsub.s32 7, %v2372_v26 }
 0x557   :  { %v927_v40 = vmul.f32 %v2550_v56, %v919_v39  ;;  %v1797_v39 = vld [vmem:[%s2714_s5] sm:$0xff] }
 0x559   :  { %2099 = vmatmul.mubr.msk.f32.vlgmr.msra.gmra.mrb[18].mxu1 %vm172_vm2, %v927_v40  ;;  %v1798_v40 = vld [vmem:[%s2714_s5 + $0x8] sm:$0xff] }
 0x55a   :  { %2169 = vmatpush3.bf16.msra.mxu1 %v2166_v57 }
 0x55b   :  { %2171 = vmatprep.subr.bf16.mxu1 %v2170_v47 }
 0x55e   :  { %2173 = vmatpush3.bf16.msra.mxu1 %v2170_v47 }
 0x55f   :  { %2175 = vmatprep.subr.bf16.mxu1 %v2174_v34 }
 0x58f   :  { %v1000_v41 = vpop.f32.mrb[6].mxu0 }
 0x590   :  { %v2065_v38 = vpop.f32.mrb[7].mxu0 }
 0x591   :  { %v2182_v38 = vpack.c.bf16 %v1798_v40, %v1797_v39 }
 0x593   :  { %2183 = vmatprep.subr.bf16.mxu0 %v2182_v38 }
 0x594   :  { %2185 = vmatpush3.bf16.msra.mxu0 %v2182_v38 }
 0x5ec   :  { %v1076_v43 = vpop.f32.mrb[12].mxu1 }
 0x5ed   :  { %v1152_v44 = vpop.f32.mrb[8].mxu0  ;;  %v2070_v45 = vpop.f32.mrb[13].mxu1  ;;  %1538 = vrot.lane.b32.xlu0 %v1076_v43, %s2301_s13  ;;  %v1800_v43 = vld [vmem:[%s2714_s5 + $0x18] sm:$0xff] }
 0x5ee   :  { %v2075_v56 = vpop.f32.mrb[9].mxu0  ;;  %v1801_v45 = vld [vmem:[%s2714_s5 + $0x20] sm:$0xff] }
 0x5ef   :  { %v2190_v53 = vpack.c.bf16 %v1802_v42, %v1801_v45 }
 0x5f0   :  { %v1228_v51 = vpop.f32.mrb[14].mxu1 }
 0x5f1   :  { %v2080_v58 = vpop.f32.mrb[15].mxu1  ;;  %1546 = vrot.lane.b32.xlu0 %v1152_v44, %s2302_s22 }
 0x5f2   :  { %v1687_v58 = vsub.s32 4, %v2372_v26 }
 0x5f4   :  { %v1380_v59 = vpop.f32.mrb[16].mxu1 }
 0x5f5   :  { %v1304_v60 = vpop.f32.mrb[10].mxu0  ;;  %1540 = vrot.lane.b32.xlu1 %v1380_v59, %s2301_s13  ;;  %v2090_v61 = vpop.f32.mrb[17].mxu1  ;;  %1554 = vrot.lane.b32.xlu0 %v1228_v51, %s2303_s23  ;;  %v1693_v59 = vsub.s32 5, %v2372_v26 }
 0x5f6   :  { %v2085_v62 = vpop.f32.mrb[11].mxu0 }
 0x5f9   :  { %v1456_v63 = vpop.f32.mrb[12].mxu0 }
 0x5fa   :  { %1548 = vrot.lane.b32.xlu1 %v1456_v63, %s2302_s22  ;;  %v2095_v2 = vpop.f32.mrb[13].mxu0  ;;  %v1694_v63 = vrot.slane %v2378_v29, %v1693_v59 }
 0x62c   :  { %v1532_v3 = vpop.f32.mrb[18].mxu1 }
 0x62d   :  { %v2100_v4 = vpop.f32.mrb[19].mxu1  ;;  %1556 = vrot.lane.b32.xlu1 %v1532_v3, %s2303_s23 }
 0x65f   :  { %v1539_v5 = vpop.permute.xlu0 %1538 }
 0x660   :  { %v1560_v8 = vsel %vm172_vm2, %v1000_v41, %v1539_v5  ;;  %v1799_v41 = vld [vmem:[%s2714_s5 + $0x10] sm:$0xff] }
 0x661   :  { %v2186_v44 = vpack.c.bf16 %v1800_v43, %v1799_v41 }
 0x663   :  { %v1547_v6 = vpop.permute.xlu0 %1546  ;;  %2187 = vmatprep.subr.bf16.mxu0 %v2186_v44 }
 0x664   :  { %v1563_v49 = vsel %vm1562_vm4, %v1560_v8, %v1547_v6  ;;  %2189 = vmatpush3.bf16.msra.mxu0 %v2186_v44 }
 0x665   :  { %2191 = vmatprep.subr.bf16.mxu0 %v2190_v53 }
 0x667   :  { %v1555_v54 = vpop.permute.xlu0 %1554  ;;  %v1541_v46 = vpop.permute.xlu1 %1540 }
 0x668   :  { %v1566_v48 = vsel %vm1565_vm5, %v1563_v49, %v1555_v54  ;;  %v1561_v10 = vsel %vm172_vm2, %v1304_v60, %v1541_v46  ;;  %2193 = vmatpush3.bf16.msra.mxu0 %v2190_v53  ;;  %v1688_v60 = vrot.slane %v2378_v29, %v1687_v58  ;;  %v1803_v49 = vld [vmem:[%s2714_s5 + $0x30] sm:$0xff]  ;;  %v1804_v54 = vld [vmem:[%s2714_s5 + $0x38] sm:$0xff]  ;;  %v1805_v46 = vld [vmem:[%s2714_s5 + $0x40] sm:$0xff] }
 0x669   :  { %2109 = vmatprep.mubr.msk.f32.mxu1 %vm27_vm0, %v1566_v48  ;;  %v2194_v48 = vpack.c.bf16 %v1804_v54, %v1803_v49 }
 0x66b   :  { %2195 = vmatprep.subr.bf16.mxu0 %v2194_v48 }
 0x66c   :  { %v1549_v9 = vpop.permute.xlu1 %1548  ;;  %2197 = vmatpush3.bf16.msra.mxu0 %v2194_v48 }
 0x66d   :  { %v1564_v11 = vsel %vm1562_vm4, %v1561_v10, %v1549_v9  ;;  %v1806_v9 = vld [vmem:[%s2714_s5 + $0x48] sm:$0xff] }
 0x66e   :  { %v2198_v10 = vpack.c.bf16 %v1806_v9, %v1805_v46 }
 0x670   :  { %2199 = vmatprep.subr.bf16.mxu0 %v2198_v10 }
 0x671   :  { %2201 = vmatpush3.bf16.msra.mxu0 %v2198_v10 }
 0x69f   :  { %v1557_v7 = vpop.permute.xlu1 %1556 }
 0x6a0   :  { %v1567_v12 = vsel %vm1565_vm5, %v1564_v11, %v1557_v7  ;;  %v1807_v11 = vld [vmem:[%s2714_s5 + $0x50] sm:$0xff]  ;;  %v1808_v7 = vld [vmem:[%s2714_s5 + $0x58] sm:$0xff] }
 0x6a1   :  { %2110 = vmatmul.mubr.msk.f32.vlgmr.msra.gmra.mrb[20].mxu1 %vm27_vm0, %v1567_v12  ;;  %v2202_v12 = vpack.c.bf16 %v1808_v7, %v1807_v11 }
 0x6a2   :  { %2177 = vmatpush3.bf16.msra.mxu1 %v2174_v34 }
 0x6a3   :  { %2179 = vmatprep.subr.bf16.mxu1 %v2178_v37  ;;  %2203 = vmatprep.subr.bf16.mxu0 %v2202_v12 }
 0x6a4   :  { %2205 = vmatpush3.bf16.msra.mxu0 %v2202_v12 }
 0x6a6   :  { %2181 = vmatpush3.bf16.msra.mxu1 %v2178_v37  ;;  %v1816_v37 = vrot.slane %v2378_v29, %v1815_v36 }
 0x774   :  { %v2111_v15 = vpop.f32.mrb[20].mxu1 }
 0x775   :  { %v1654_v16 = vadd.f32 %v2111_v15, %v1575_v14  ;;  %v1648_v17 = vpop.f32.mrb[21].mxu1 }
 0x776   :  { %v1649_v18 = vadd.f32 %v1648_v17, %v1575_v14  ;;  %v1810_v14 = vld [vmem:[%s2714_s5 + $0x68] sm:$0xff]  ;;  %v1812_v17 = vld [vmem:[%s2714_s5 + $0x78] sm:$0xff] }
 0x777   :  { %v2609_v19 = vadd.f32 %v1654_v16, %v2349_v1  ;;  %v2206_v15 = vpack.c.bf16 %v1810_v14, %v1809_v13  ;;  %v1811_v16 = vld [vmem:[%s2714_s5 + $0x70] sm:$0xff]  ;;  %s2304_s5 = smov [#allocation2]  }
 0x778   :  { %v2612_v20 = vadd.f32 %v1649_v18, %v2344_v0  ;;  %v2210_v18 = vpack.c.bf16 %v1812_v17, %v1811_v16  ;;  %s1901_s1 = sshll.u32 %s2304_s5, 4  ;;  %s1902_s1 = int_to_ptr.vmem [resolvable:$true] %s1901_s1 }
 0x779   :  { %v1662_v21 = vsel %vm27_vm0, %v2609_v19, 0.0  ;;  %2207 = vmatprep.subr.bf16.mxu0 %v2206_v15  ;;  %s2270_s9 = scalar_lea.vmem %s1902_s1, 256  ;;  %p2275_p1 = scmp.lt.s32.totalorder %s1902_s1, %s1902_s1 }
 0x77a   :  { %1663 = vadd.xlane.f32.xlu1 %v1662_v21  ;;  %v1659_v22 = vsel %vm27_vm0, %v2612_v20, 0.0  ;;  %2209 = vmatpush3.bf16.msra.mxu0 %v2206_v15  ;;  %v1703_v21 = vsub.s32 6, %v2372_v26  ;;  %p2271_p0 = scmp.ne.s32.totalorder %s1902_s1, %s2270_s9  ;;  %p2276_p2 = scmp.lt.s32.totalorder %s2270_s9, %s2270_s9 }
 0x77b   :  { %1660 = vadd.xlane.f32.xlu0 %v1659_v22  ;;  %2211 = vmatprep.subr.bf16.mxu0 %v2210_v18 }
 0x77c   :  { %v1704_v22 = vrot.slane %v2378_v29, %v1703_v21  ;;  %p2277_p3 = por %p2276_p2, %p2275_p1 }
 0x77e   :  { %2213 = vmatpush3.bf16.msra.mxu0 %v2210_v18  ;;  %p2278_p4 = pnand %p2277_p3, %p2271_p0 }
 0x807   :  { %v1664_v50 = vpop.xlane.xlu1 %1663 }
 0x808   :  { %v1666_v23 = vmul.f32 0.03125, %v1664_v50  ;;  %v1661_v24 = vpop.xlane.xlu0 %1660 }
 0x809   :  { %v1665_v25 = vmul.f32 0.03125, %v1661_v24 }
 0x80a   :  { %v1668_v27 = vsub.f32 %v2609_v19, %v1666_v23 }
 0x80b   :  { %v1667_v1 = vsub.f32 %v2612_v20, %v1665_v25 }
 0x80c   :  { %v1670_v30 = vmul.f32 %v1668_v27, %v1668_v27 }
 0x80d   :  { %v1669_v28 = vmul.f32 %v1667_v1, %v1667_v1 }
 0x80e   :  { %v1674_v31 = vsel %vm27_vm0, %v1670_v30, 0.0 }
 0x80f   :  { %v1671_v0 = vsel %vm27_vm0, %v1669_v28, 0.0 }
 0x810   :  { %1672 = vadd.xlane.f32.xlu0 %v1671_v0 }
 0x814   :  { %1675 = vadd.xlane.f32.xlu0 %v1674_v31 }
 0x89d   :  { %v1673_v55 = vpop.xlane.xlu0 %1672 }
 0x89e   :  { %v1677_v56 = vmul.f32 0.03125, %v1673_v55 }
 0x8a0   :  { %v1679_v57 = vadd.f32 1e-05, %v1677_v56 }
 0x8a1   :  { %v1676_v52 = vpop.xlane.xlu0 %1675 }
 0x8a2   :  { %2262 = vrsqrt.f32 %v1679_v57  ;;  %v1678_v47 = vmul.f32 0.03125, %v1676_v52 }
 0x8a4   :  { %v1680_v51 = vadd.f32 1e-05, %v1678_v47 }
 0x8a6   :  { %2264 = vrsqrt.f32 %v1680_v51 }
 0x8ac   :  { %v2263_v61 = vpop.eup %2262 }
 0x8ad   :  { %v1683_v62 = vmul.f32 %v2263_v61, %v1667_v1 }
 0x8af   :  { %v1689_v2 = vmul.f32 %v1688_v60, %v1683_v62 }
 0x8b0   :  { %v2265_v3 = vpop.eup %2264 }
 0x8b1   :  { %v1684_v4 = vmul.f32 %v2265_v3, %v1668_v27  ;;  %v1695_v5 = vadd.f32 %v1694_v63, %v1689_v2 }
 0x8b3   :  { %v1690_v6 = vmul.f32 %v1688_v60, %v1684_v4  ;;  %2120 = vmatprep.mubr.msk.f32.mxu1 %vm27_vm0, %v1695_v5 }
 0x8b5   :  { %v1696_v8 = vadd.f32 %v1694_v63, %v1690_v6 }
 0x8b7   :  { %2121 = vmatmul.mubr.msk.f32.vlgmr.msra.gmra.mrb[22].mxu1 %vm27_vm0, %v1696_v8 }
 0x98a   :  { %v2122_v50 = vpop.f32.mrb[22].mxu1 }
 0x98b   :  { %v1783_v23 = vadd.f32 %v2122_v50, %v1704_v22  ;;  %v1777_v24 = vpop.f32.mrb[23].mxu1 }
 0x98c   :  { %v1778_v25 = vadd.f32 %v1777_v24, %v1704_v22 }
 0x98d   :  { %v1790_v27 = vmul.f32 0.70710677, %v1783_v23  ;;  %v1787_v33 = vmul.f32 0.5, %v1783_v23 }
 0x98e   :  { %v1789_v1 = vmul.f32 0.70710677, %v1778_v25  ;;  %v1786_v31 = vmul.f32 0.5, %v1778_v25 }
 0x98f   :  { %2266 = verf.f32 %v1790_v27 }
 0x990   :  { %2268 = verf.f32 %v1789_v1 }
 0x999   :  { %v2267_v28 = vpop.eup %2266 }
 0x99a   :  { %v2269_v0 = vpop.eup %2268  ;;  %v1794_v30 = vadd.f32 1.0, %v2267_v28 }
 0x99b   :  { %v1793_v32 = vadd.f32 1.0, %v2269_v0 }
 0x99c   :  { %v1796_v35 = vmul.f32 %v1794_v30, %v1787_v33 }
 0x99d   :  { %v1795_v34 = vmul.f32 %v1793_v32, %v1786_v31 }
 0x99f   :  { %2155 = vmatprep.mubr.f32.mxu0 %v1795_v34 }
 0x9a0   :  { %2156 = vmatmul.mubr.f32.vlgmr.msra.gmra.mrb[14].mxu0 %v1796_v35 }
 0xa73   :  { %v2157_v39 = vpop.f32.mrb[14].mxu0 }
 0xa74   :  { %v1889_v40 = vadd.f32 %v2157_v39, %v1816_v37  ;;  %v1883_v41 = vpop.f32.mrb[15].mxu0 }
 0xa75   :  { %v1884_v38 = vadd.f32 %v1883_v41, %v1816_v37 }
 0xa76   :  { %v1893_v43 = vadd.f32 %v1889_v40, %v2609_v19 }
 0xa77   :  { %v1892_v44 = vadd.f32 %v1884_v38, %v2612_v20 }
 0xa78   :  { %1895 = vst.msk [vmem:[#allocation2 + $0x8] sm:$0xff] %vm27_vm0, %v1893_v43 }
 0xa79   :  { %1894 = vst.msk [vmem:[#allocation2] sm:$0xff] %vm27_vm0, %v1892_v44 }
 0xa7a   :  { %2281 = shalt.err (!%p2278_p4)
}
 0xa7b   :  { %s2282_s11 = scalar_lea.hbm %s2715_s6, 256 }
 0xa7c   :  { %p2283_p5 = scmp.ne.s32.totalorder %s2715_s6, %s2282_s11  ;;  %p2286_p6 = scmp.lt.u32.totalorder %s2282_s11, %s2715_s6 }
 0xa7e   :  { %p2288_p7 = pnand %p2286_p6, %p2283_p5 }
 0xa80   :  { %2291 = shalt.err (!%p2288_p7)
}
 0xa81   :  { %s2305_s17 = smov 128  }
 0xa82   :  { %1907 = dma.vmem_to_hbm [thread:$0]  %s1902_s1, 256, %s2715_s6, [#allocation3], %s2305_s17, %s2305_s17, %s2301_s13  }
 0xa83   :  { %2292 = dma.done.wait [#allocation3], 256  }
 0xa84   :  { %2293 = vsyncadd [#allocation3], 4294967040 }
 0xa85   :  { %1911 = vsyncpa [#allocation3], 1 }

</bundles_post_ra>
